<compile_context>
chip_gen: v5e
topology: v5e:2x2
jax: 0.10.0
libtpu: 0.0.40
codegen_flags: <defaults>
</compile_context>

<pallas_src>
import functools

import jax
import jax.numpy as jnp
from jax.experimental import pallas as pl
from jax.experimental.pallas import tpu as pltpu


# ----------------------------------------------------------------------------
# Interpolation operator construction (PyTorch bilinear, align_corners=False)
# ----------------------------------------------------------------------------
def _interp_matrix(in_size: int, scale: int) -> jnp.ndarray:
    """Row-stochastic (out_size, in_size) matrix reproducing PyTorch's bilinear
    upsample with align_corners=False (half-pixel centers, edge clamp)."""
    out_size = in_size * scale
    dst = jnp.arange(out_size, dtype=jnp.float32)
    src = jnp.maximum((dst + 0.5) / float(scale) - 0.5, 0.0)   # clamp negative src
    i0 = jnp.minimum(jnp.floor(src).astype(jnp.int32), in_size - 1)
    i1 = jnp.minimum(i0 + 1, in_size - 1)
    w1 = src - i0.astype(jnp.float32)
    w0 = 1.0 - w1
    return (jax.nn.one_hot(i0, in_size, dtype=jnp.float32) * w0[:, None]
            + jax.nn.one_hot(i1, in_size, dtype=jnp.float32) * w1[:, None])


def _pick_row_tile(rows: int, k: int, budget_bytes: int = 4 << 20) -> int:
    """Largest divisor of `rows` that is a multiple of 8 (sublane tile) whose
    f32 (tile, k) operator block fits `budget_bytes`; full extent if it fits
    (a block equal to the full array dim is always legal)."""
    if rows * k * 4 <= budget_bytes:
        return rows
    for t in range(rows, 0, -1):
        if rows % t == 0 and t % 8 == 0 and t * k * 4 <= budget_bytes:
            return t
    # TODO(synk): extreme shapes with no multiple-of-8 divisor under budget fall
    # back to the full extent (may need a K-dim split as well).
    return rows


# ----------------------------------------------------------------------------
# Kernel
# ----------------------------------------------------------------------------
def _upsampling_add_kernel(x_ref, skip_ref, wwt_ref, mcw_ref, b_ref, o_ref, xw_ref):
    # x_ref   : (1, Cin*H, W)      input, W in lanes (NCHW-contiguous view)
    # skip_ref: (1, TR, Wo)        skip block matching the output block
    # wwt_ref : (W, Wo)            transposed W-axis bilinear operator (f32)
    # mcw_ref : (TR, Cin*H)        kron(conv1x1 * BN-scale, Wh) row block (f32)
    # b_ref   : (TR, 1)            BN shift per output row (f32)
    # o_ref   : (1, TR, Wo)
    # xw_ref  : (Cin*H, Wo) f32    scratch: W-upsampled input, reused across TR tiles

    @pl.when(pl.program_id(1) == 0)
    def _():
        # Stage 1 (once per batch): W-axis bilinear upsample on the lane dim.
        xw_ref[...] = jnp.dot(x_ref[0], wwt_ref[...],
                              preferred_element_type=jnp.float32)

    # Stage 2: fused {1x1 conv, BN scale, H-axis upsample} as one MXU matmul.
    up = jnp.dot(mcw_ref[...], xw_ref[...], preferred_element_type=jnp.float32)
    out = up + b_ref[...] + skip_ref[0].astype(jnp.float32)
    o_ref[0] = out.astype(o_ref.dtype)


# ----------------------------------------------------------------------------
# Wrapper
# ----------------------------------------------------------------------------
@functools.partial(jax.jit, static_argnames=("scale_factor", "eps"))
def upsampling_add(x, x_skip, conv_w, bn_gamma, bn_beta, bn_mean, bn_var,
                   *, scale_factor: int = 2, eps: float = 1e-5):
    """out = BN(Conv1x1(Upsample_bilinear(x))) + x_skip  (NCHW tensors)."""
    N, Cin, H, W = x.shape
    Ns, Cout, Ho, Wo = x_skip.shape
    assert Ns == N and Ho == H * scale_factor and Wo == W * scale_factor
    assert conv_w.shape == (Cout, Cin, 1, 1)

    # ---- fold Conv2d(1x1, bias=False) + BatchNorm(inference) into (Wc, b) ----
    w = conv_w.reshape(Cout, Cin).astype(jnp.float32)
    inv_std = bn_gamma.astype(jnp.float32) * jax.lax.rsqrt(
        bn_var.astype(jnp.float32) + eps)                        # (Cout,)
    wc = w * inv_std[:, None]                                    # (Cout, Cin)
    bias = bn_beta.astype(jnp.float32) - bn_mean.astype(jnp.float32) * inv_std

    # ---- separable bilinear operators ----
    wh = _interp_matrix(H, scale_factor)                         # (Ho, H)
    ww = _interp_matrix(W, scale_factor)                         # (Wo, W)
    wwt = ww.T                                                   # (W, Wo)
    mcw = jnp.kron(wc, wh)                                       # (Cout*Ho, Cin*H)
    bias_rows = jnp.repeat(bias, Ho)[:, None]                    # (Cout*Ho, 1)

    # Contiguous leading-dim collapses only (no data movement).
    x2d = x.reshape(N, Cin * H, W)
    skip2d = x_skip.reshape(N, Cout * Ho, Wo)

    rows, k = Cout * Ho, Cin * H
    tr = _pick_row_tile(rows, k)
    grid = (N, rows // tr)

    out2d = pl.pallas_call(
        _upsampling_add_kernel,
        out_shape=jax.ShapeDtypeStruct((N, rows, Wo), x_skip.dtype),
        grid_spec=pltpu.PrefetchScalarGridSpec(
            num_scalar_prefetch=0,
            grid=grid,
            in_specs=[
                # x: constant across j (innermost axis) -> kept resident per batch
                pl.BlockSpec((1, k, W), lambda n, j: (n, 0, 0)),
                pl.BlockSpec((1, tr, Wo), lambda n, j: (n, j, 0)),
                pl.BlockSpec((W, Wo), lambda n, j: (0, 0)),
                pl.BlockSpec((tr, k), lambda n, j: (j, 0)),
                pl.BlockSpec((tr, 1), lambda n, j: (j, 0)),
            ],
            out_specs=pl.BlockSpec((1, tr, Wo), lambda n, j: (n, j, 0)),
            scratch_shapes=[pltpu.VMEM((k, Wo), jnp.float32)],
        ),
        compiler_params=pltpu.CompilerParams(
            dimension_semantics=("parallel", "arbitrary"),
            vmem_limit_bytes=48 * 1024 * 1024),
    )(x2d, skip2d, wwt, mcw, bias_rows)

    return out2d.reshape(N, Cout, Ho, Wo)


# ----------------------------------------------------------------------------
# Pure-JAX reference (independent gather-based path) for correctness checking
# ----------------------------------------------------------------------------
def _torch_bilinear_upsample_ref(x, scale):
    N, C, H, W = x.shape

    def idx_w(size):
        dst = jnp.arange(size * scale, dtype=jnp.float32)
        src = jnp.maximum((dst + 0.5) / scale - 0.5, 0.0)
        i0 = jnp.minimum(jnp.floor(src).astype(jnp.int32), size - 1)
        i1 = jnp.minimum(i0 + 1, size - 1)
        w1 = src - i0.astype(jnp.float32)
        return i0, i1, w1

    hi0, hi1, hw1 = idx_w(H)
    wi0, wi1, ww1 = idx_w(W)
    rows = (x[:, :, hi0, :] * (1.0 - hw1)[None, None, :, None]
            + x[:, :, hi1, :] * hw1[None, None, :, None])
    return (rows[:, :, :, wi0] * (1.0 - ww1)
            + rows[:, :, :, wi1] * ww1)


def _upsampling_add_ref(x, x_skip, conv_w, gamma, beta, mean, var, scale, eps=1e-5):
    up = _torch_bilinear_upsample_ref(x, scale)
    conv = jnp.einsum('oi,nihw->nohw', conv_w.reshape(conv_w.shape[0], -1), up)
    inv = gamma / jnp.sqrt(var + eps)
    bn = (conv - mean[None, :, None, None]) * inv[None, :, None, None] \
        + beta[None, :, None, None]
    return bn + x_skip


# ----------------------------------------------------------------------------
if __name__ == "__main__":
    key = jax.random.PRNGKey(0)
    k1, k2, k3, k4, k5, k6, k7 = jax.random.split(key, 7)

    N, Cin, Cout, H, W, S = 2, 8, 4, 16, 16, 2
    x = jax.random.normal(k1, (N, Cin, H, W), dtype=jnp.float32)
    x_skip = jax.random.normal(k2, (N, Cout, H * S, W * S), dtype=jnp.float32)

    # 1x1 conv weight (PyTorch layout: (Cout, Cin, 1, 1)) and BatchNorm params.
    conv_w = jax.random.normal(k3, (Cout, Cin, 1, 1), dtype=jnp.float32) / jnp.sqrt(Cin)
    bn_gamma = 0.5 + jax.random.uniform(k4, (Cout,), dtype=jnp.float32)
    bn_beta = 0.1 * jax.random.normal(k5, (Cout,), dtype=jnp.float32)
    bn_mean = 0.1 * jax.random.normal(k6, (Cout,), dtype=jnp.float32)
    bn_var = 0.5 + jax.random.uniform(k7, (Cout,), dtype=jnp.float32)

    out = upsampling_add(x, x_skip, conv_w, bn_gamma, bn_beta, bn_mean, bn_var,
                         scale_factor=S)
    out = jax.block_until_ready(out)

    assert out.shape == (N, Cout, H * S, W * S), out.shape
    assert out.dtype == x_skip.dtype

    ref = _upsampling_add_ref(x, x_skip, conv_w, bn_gamma, bn_beta, bn_mean,
                              bn_var, S)
    # Loose tolerance: TPU default f32 matmul precision uses bf16 passes.
    err = float(jnp.max(jnp.abs(out - ref)))
    assert err < 3e-2, f"max abs err vs reference = {err}"

    print("KERNEL_OK")
</pallas_src>

<mosaic_0001>
module attributes {stable_mosaic.version = 11 : i64} {
  func.func @_upsampling_add_kernel(%arg0: i32, %arg1: i32, %arg2: memref<1x128x16xf32, #tpu.memory_space<vmem>>, %arg3: memref<1x128x32xf32, #tpu.memory_space<vmem>>, %arg4: memref<16x32xf32, #tpu.memory_space<vmem>>, %arg5: memref<128x128xf32, #tpu.memory_space<vmem>>, %arg6: memref<128x1xf32, #tpu.memory_space<vmem>>, %arg7: memref<1x128x32xf32, #tpu.memory_space<vmem>>, %arg8: memref<128x32xf32, #tpu.memory_space<vmem>>) attributes {dimension_semantics = [#tpu.dimension_semantics<parallel>, #tpu.dimension_semantics<arbitrary>], iteration_bounds = array<i64: 2, 1>, scalar_prefetch = 0 : i64, scratch_operands = 1 : i64, tpu.core_type = #tpu.core_type<tc>, window_params = [{transform_indices = @transform_0, window_bounds = array<i64: 1, 128, 16>}, {transform_indices = @transform_1, window_bounds = array<i64: 1, 128, 32>}, {pipeline_mode = #tpu.pipeline_mode<synchronous>, transform_indices = @transform_2, window_bounds = array<i64: 16, 32>}, {transform_indices = @transform_3, window_bounds = array<i64: 128, 128>}, {transform_indices = @transform_4, window_bounds = array<i64: 128, 1>}, {transform_indices = @transform_5, window_bounds = array<i64: 1, 128, 32>}]} {
    %c0_i32 = arith.constant 0 : i32
    %0 = arith.cmpi eq, %arg1, %c0_i32 : i32
    %1 = arith.extui %0 : i1 to i32
    %c0_i32_0 = arith.constant 0 : i32
    %2 = arith.cmpi ne, %1, %c0_i32_0 : i32
    scf.if %2 {
      %c0_12 = arith.constant 0 : index
      %c0_13 = arith.constant 0 : index
      %c0_14 = arith.constant 0 : index
      %15 = vector.load %arg2[%c0_12, %c0_13, %c0_14] : memref<1x128x16xf32, #tpu.memory_space<vmem>>, vector<1x128x16xf32>
      %16 = vector.shape_cast %15 : vector<1x128x16xf32> to vector<128x16xf32>
      %c0_15 = arith.constant 0 : index
      %c0_16 = arith.constant 0 : index
      %17 = vector.load %arg4[%c0_15, %c0_16] : memref<16x32xf32, #tpu.memory_space<vmem>>, vector<16x32xf32>
      %cst_17 = arith.constant dense<0.000000e+00> : vector<128x32xf32>
      %18 = tpu.matmul %16, %17, %cst_17 {dimension_numbers = #tpu.dot_dimension_numbers<[1], [0], [0], [1], [0, 0, 1, 1], [], []>} : vector<128x16xf32>, vector<16x32xf32>, vector<128x32xf32> -> vector<128x32xf32>
      %c0_18 = arith.constant 0 : index
      %c0_19 = arith.constant 0 : index
      %19 = vector.load %arg8[%c0_18, %c0_19] : memref<128x32xf32, #tpu.memory_space<vmem>>, vector<128x32xf32>
      tpu.vector_store %arg8[%c0_18, %c0_19], %18 {strides = array<i32>} : memref<128x32xf32, #tpu.memory_space<vmem>>, vector<128x32xf32>,
    } else {
    }
    %c0 = arith.constant 0 : index
    %c0_1 = arith.constant 0 : index
    %3 = vector.load %arg5[%c0, %c0_1] : memref<128x128xf32, #tpu.memory_space<vmem>>, vector<128x128xf32>
    %c0_2 = arith.constant 0 : index
    %c0_3 = arith.constant 0 : index
    %4 = vector.load %arg8[%c0_2, %c0_3] : memref<128x32xf32, #tpu.memory_space<vmem>>, vector<128x32xf32>
    %cst = arith.constant dense<0.000000e+00> : vector<128x32xf32>
    %5 = tpu.matmul %3, %4, %cst {dimension_numbers = #tpu.dot_dimension_numbers<[1], [0], [0], [1], [0, 0, 1, 1], [], []>} : vector<128x128xf32>, vector<128x32xf32>, vector<128x32xf32> -> vector<128x32xf32>
    %c0_4 = arith.constant 0 : index
    %c0_5 = arith.constant 0 : index
    %6 = vector.load %arg6[%c0_4, %c0_5] : memref<128x1xf32, #tpu.memory_space<vmem>>, vector<128x1xf32>
    %7 = vector.broadcast %6 : vector<128x1xf32> to vector<128x32xf32>
    %8 = arith.addf %5, %7 : vector<128x32xf32>
    %c0_6 = arith.constant 0 : index
    %c0_7 = arith.constant 0 : index
    %c0_8 = arith.constant 0 : index
    %9 = vector.load %arg3[%c0_6, %c0_7, %c0_8] : memref<1x128x32xf32, #tpu.memory_space<vmem>>, vector<1x128x32xf32>
    %10 = vector.shape_cast %9 : vector<1x128x32xf32> to vector<128x32xf32>
    %11 = arith.addf %8, %10 : vector<128x32xf32>
    %c0_9 = arith.constant 0 : index
    %c0_10 = arith.constant 0 : index
    %c0_11 = arith.constant 0 : index
    %12 = vector.load %arg7[%c0_9, %c0_10, %c0_11] : memref<1x128x32xf32, #tpu.memory_space<vmem>>, vector<1x128x32xf32>
    %13 = vector.shape_cast %12 : vector<1x128x32xf32> to vector<128x32xf32>
    %14 = vector.shape_cast %11 : vector<128x32xf32> to vector<1x128x32xf32>
    tpu.vector_store %arg7[%c0_9, %c0_10, %c0_11], %14 {strides = array<i32>} : memref<1x128x32xf32, #tpu.memory_space<vmem>>, vector<1x128x32xf32>,
    return
  }
  func.func @transform_0(%arg0: i32, %arg1: i32) -> (i32, i32, i32) {
    %c0_i32 = arith.constant 0 : i32
    %c0_i32_0 = arith.constant 0 : i32
    %c0_i32_1 = arith.constant 0 : i32
    return %arg0, %c0_i32, %c0_i32_0 : i32, i32, i32
  }
  func.func @transform_1(%arg0: i32, %arg1: i32) -> (i32, i32, i32) {
    %c0_i32 = arith.constant 0 : i32
    %c0_i32_0 = arith.constant 0 : i32
    return %arg0, %arg1, %c0_i32 : i32, i32, i32
  }
  func.func @transform_2(%arg0: i32, %arg1: i32) -> (i32, i32) {
    %c0_i32 = arith.constant 0 : i32
    %c0_i32_0 = arith.constant 0 : i32
    %c0_i32_1 = arith.constant 0 : i32
    return %c0_i32, %c0_i32_0 : i32, i32
  }
  func.func @transform_3(%arg0: i32, %arg1: i32) -> (i32, i32) {
    %c0_i32 = arith.constant 0 : i32
    %c0_i32_0 = arith.constant 0 : i32
    return %arg1, %c0_i32 : i32, i32
  }
  func.func @transform_4(%arg0: i32, %arg1: i32) -> (i32, i32) {
    %c0_i32 = arith.constant 0 : i32
    %c0_i32_0 = arith.constant 0 : i32
    return %arg1, %c0_i32 : i32, i32
  }
  func.func @transform_5(%arg0: i32, %arg1: i32) -> (i32, i32, i32) {
    %c0_i32 = arith.constant 0 : i32
    %c0_i32_0 = arith.constant 0 : i32
    return %arg0, %arg1, %c0_i32 : i32, i32, i32
  }
}

</mosaic_0001>

<bundles_post_ra>
// kernel: upsampling_add.1
= control target key start
LH: loop header
LB: loop body
LE: loop exit
PB: predicated region body
PF: predicated region fallthrough
CT: control target
= control target key end

     0   :  { %10 = vsyncpa [#allocation4], 0  ;;  %s1427_s0 = inlined_call_operand.vmem [shape: f32[2,128,16], index: 0, kind: input, shape index: {}]   ;;  %s1428_s1 = inlined_call_operand.vmem [shape: f32[2,128,32], index: 1, kind: input, shape index: {}]   ;;  %s1429_s2 = inlined_call_operand.vmem [shape: f32[16,32], index: 2, kind: input, shape index: {}]   ;;  %s1430_s3 = inlined_call_operand.vmem [shape: f32[128,128], index: 3, kind: input, shape index: {}]   ;;  %s1431_s4 = inlined_call_operand.vmem [shape: f32[128,1], index: 4, kind: input, shape index: {}]   ;;  %s1432_s5 = inlined_call_operand.hbm [shape: f32[2,128,32], index: 5, kind: output, shape index: {}]  }
   0x1   :  { %12 = vsyncpa [#allocation4 + $0x1], 0  ;;  %s1096_s18 = smov 0   ;;  %s1098_s19 = smov 0  }
   0x2   :  { %s1100_s20 = smov 0   ;;  %s1102_s21 = smov 0  }
   0x3   :  { %s1104_s22 = smov 0   ;;  %s1106_s23 = smov 0  }
   0x4 LB: > { %s852_s24 = sadd.s32 4294967295, %s1061_s23   ;;  %s853_s25 = sadd.s32 4294967294, %s1061_s23   ;;  %s1061_s23 = sphi %s1106_s23, %s18_s23   ;;  %s1057_s22 = sphi %s1104_s22, %s1439_s22   ;;  %s1053_s21 = sphi %s1102_s21, %s1438_s21   ;;  %s1049_s20 = sphi %s1100_s20, %s1437_s20   ;;  %s1045_s19 = sphi %s1098_s19, %s1436_s19   ;;  %s1041_s18 = sphi %s1096_s18, %s1435_s18  }
   0x5   : > { %s30_s26 = sadd.s32 1, %s1057_s22  ;;  %s166_s27 = sadd.s32 1, %s1049_s20 }
   0x6   : > { %p32_p0 = scmp.ge.s32.totalorder %s30_s26, 2  ;;  %p176_p1 = scmp.ne.s32.totalorder %s1049_s20, %s1045_s19 }
   0x7   : > { %p177_p2 = scmp.eq.s32.totalorder %s852_s24, 1  ;;  %p182_p3 = scmp.ne.s32.totalorder %s1045_s19, %s1041_s18 }
   0x8   : > { %s1441_s26 = smov (%p32_p0, %s30_s26), 0  ;;  %p183_p5 = scmp.eq.s32.totalorder %s853_s25, 1 }
   0x9   : > { %p1136_p4 = por %p177_p2, %p176_p1  ;;  %s161_s29 = ssub.s32 %s1057_s22, %s1441_s26 }
   0xa   : > { %p858_p6 = scmp.ge.s32.totalorder %s1061_s23, 1  ;;  %p164_p7 = scmp.eq.s32.totalorder %s161_s29, 0 }
   0xb   : > { %p1143_p8 = por %p183_p5, %p182_p3  ;;  %p243_p9 = scmp.lt.s32.totalorder %s1061_s23, 3 }
   0xc   : > { %s1149_s6 = scalar_select %p164_p7, %s1049_s20, %s166_s27  }
   0xd   : > { %p244_p10 = pnand %p858_p6, %p243_p9 }
   0xe   : > { %p290_p11 = scmp.lt.s32.totalorder (!%p244_p10), %s1053_s21, 1  ;;  %s1003_s17 = scalar_lea.hbm (!%p244_p10), %s1432_s5, 256 }
   0xf   : > { %247 = sbr.rel (%p244_p10) target bundleno = 439 (0x1b7), region = 40 }
  0x14   : > { %v339_v0 = vld [vmem:[%s1429_s2 + $0x8] sm:$0xff]  ;;  %v338_v1 = vld [vmem:[%s1429_s2] sm:$0xff]  ;;  %s1159_s11 = scalar_select %p290_p11, %s1053_s21, 1  ;;  %vm340_vm0 = vcmask 130048   ;;  %vm454_vm1 = vcmask 261120   ;;  %v1063_v32 = vmov 0  }
  0x15   : > { %403 = vmatpush.msra.mxu0 %v339_v0  ;;  %888 = vmatpush.msra.mxu3 %v339_v0  ;;  %v503_v31 = vld [vmem:[%s1431_s4] sm:$0xff]  ;;  %v504_v38 = vld [vmem:[%s1431_s4 + $0x8] sm:$0xff]  ;;  %v505_v42 = vld [vmem:[%s1431_s4 + $0x10] sm:$0xff] }
  0x16   : > { %s885_s12 = sshll.u32 %s1159_s11, 7  ;;  %980 = vset.pattern.permute.xlu0 %v1063_v32  ;;  %981 = vset.pattern.permute.xlu1 %v1063_v32  ;;  %v509_v43 = vld [vmem:[%s1431_s4 + $0x30] sm:$0xff]  ;;  %v506_v45 = vld [vmem:[%s1431_s4 + $0x18] sm:$0xff]  ;;  %v512_v46 = vld [vmem:[%s1431_s4 + $0x48] sm:$0xff]  ;;  %s887_s11 = sshll.u32 %s1053_s21, 7 }
  0x17   : > { %404 = vmatpush.msra.mxu0 %v338_v1  ;;  %889 = vmatpush.msra.mxu3 %v338_v1  ;;  %s1167_s15 = scalar_lea.vmem %s1427_s0, %s885_s12  ;;  %v510_v50 = vld [vmem:[%s1431_s4 + $0x38] sm:$0xff]  ;;  %v515_v51 = vld [vmem:[%s1431_s4 + $0x60] sm:$0xff]  ;;  %v513_v57 = vld [vmem:[%s1431_s4 + $0x50] sm:$0xff]  ;;  %s1327_s24 = scalar_lea.vmem %s1428_s1, %s885_s12 }
  0x18   : > { %v322_v2 = vld [vmem:[%s1167_s15] sm:$0xff]  ;;  %v332_v3 = vld [vmem:[%s1167_s15 + $0x50] sm:$0xff]  ;;  %v323_v4 = vld [vmem:[%s1167_s15 + $0x8] sm:$0xff]  ;;  %521 = vperm.xlu0 %980, %v503_v31   ;;  %982 = vset.pattern.permute.xlu2 %v1063_v32  ;;  %s727_s7 = scalar_lea.hbm %s1432_s5, %s887_s11 }
  0x19   : > { %864 = vmatmul.msk.f32.vlgmr.msra.gmra.mxu0 %vm340_vm0, %v322_v2  ;;  %874 = vmatmul.msk.f32.vlgmr.msra.gmra.mxu3 %vm340_vm0, %v332_v3  ;;  %v333_v5 = vld [vmem:[%s1167_s15 + $0x58] sm:$0xff]  ;;  %v324_v6 = vld [vmem:[%s1167_s15 + $0x10] sm:$0xff]  ;;  %v334_v7 = vld [vmem:[%s1167_s15 + $0x60] sm:$0xff]  ;;  %s730_s9 = sshll.u32 %s727_s7, 4  ;;  %s731_s9 = int_to_ptr.hbm [resolvable:$true] %s730_s9 }
  0x1a   : > { %v325_v8 = vld [vmem:[%s1167_s15 + $0x18] sm:$0xff]  ;;  %v335_v9 = vld [vmem:[%s1167_s15 + $0x68] sm:$0xff]  ;;  %v326_v10 = vld [vmem:[%s1167_s15 + $0x20] sm:$0xff]  ;;  %531 = vperm.xlu1 %981, %v505_v42   ;;  %s997_s10 = sshra.s32 %s731_s9, 4  ;;  %s998_s10 = int_to_ptr.hbm [resolvable:$true] %s997_s10 }
  0x1b   : > { %v336_v11 = vld [vmem:[%s1167_s15 + $0x70] sm:$0xff]  ;;  %v327_v12 = vld [vmem:[%s1167_s15 + $0x28] sm:$0xff]  ;;  %v337_v13 = vld [vmem:[%s1167_s15 + $0x78] sm:$0xff]  ;;  %s999_s13 = scalar_lea.hbm %s998_s10, 128  ;;  %p1004_p1 = scmp.lt.s32.totalorder %s998_s10, %s1432_s5 }
  0x1c   : > { %v328_v14 = vld [vmem:[%s1167_s15 + $0x30] sm:$0xff]  ;;  %v329_v15 = vld [vmem:[%s1167_s15 + $0x38] sm:$0xff]  ;;  %v330_v16 = vld [vmem:[%s1167_s15 + $0x40] sm:$0xff]  ;;  %p1000_p12 = scmp.ne.s32.totalorder %s998_s10, %s999_s13  ;;  %p1005_p2 = scmp.lt.s32.totalorder %s1003_s17, %s999_s13 }
  0x1d   : > { %v331_v17 = vld [vmem:[%s1167_s15 + $0x48] sm:$0xff]  ;;  %v507_v56 = vld [vmem:[%s1431_s4 + $0x20] sm:$0xff]  ;;  %v518_v59 = vld [vmem:[%s1431_s4 + $0x78] sm:$0xff]  ;;  %s287_s15 = sand.u32 1, %s1045_s19  }
  0x1e   : > { %541 = vperm.xlu2 %982, %v507_v56   ;;  %v471_v61 = vld [vmem:[%s1430_s3] sm:$0xff]  ;;  %v478_v63 = vld [vmem:[%s1430_s3 + $0x38] sm:$0xff]  ;;  %v485_v0 = vld [vmem:[%s1430_s3 + $0x70] sm:$0xff]  ;;  %s859_s25 = sshll.u32 %s287_s15, 7  ;;  %s714_s21 = scalar_lea.sflag [#allocation4], %s287_s15 }
  0x1f   : > { %v508_v1 = vld [vmem:[%s1431_s4 + $0x28] sm:$0xff]  ;;  %s1334_s27 = scalar_lea.vmem [#allocation3], %s859_s25  ;;  %v666_v56 = vld [vmem:[%s1327_s24 + $0x10] sm:$0xff]  ;;  %p1001_p13 = pnand %p1000_p12, %p1136_p4 }
  0x20   : > { %526 = vperm.xlu0 %980, %v504_v38   ;;  %v516_v2 = vld [vmem:[%s1431_s4 + $0x68] sm:$0xff]  ;;  %s728_s8 = sshll.u32 %s1334_s27, 4  ;;  %p1006_p3 = por %p1005_p2, %p1004_p1  ;;  %s729_s8 = int_to_ptr.vmem [resolvable:$true] %s728_s8 }
  0x21   : > { %865 = vmatmul.msk.f32.gmra.mxu0 %vm340_vm0, %v323_v4  ;;  %875 = vmatmul.msk.f32.gmra.mxu3 %vm340_vm0, %v333_v5  ;;  %v472_v3 = vld [vmem:[%s1430_s3 + $0x8] sm:$0xff]  ;;  %v479_v4 = vld [vmem:[%s1430_s3 + $0x40] sm:$0xff]  ;;  %v486_v5 = vld [vmem:[%s1430_s3 + $0x78] sm:$0xff]  ;;  %p1002_p0 = pneg %p1001_p13 }
  0x22   : > { %536 = vperm.xlu1 %981, %v506_v45   ;;  %v665_v42 = vld [vmem:[%s1327_s24 + $0x8] sm:$0xff] }
  0x23   : > { %p1007_p5 = pnand %p1006_p3, %p1002_p0 }
  0x26   : > { %546 = vperm.xlu2 %982, %v508_v1   ;;  %v667_v1 = vld [vmem:[%s1327_s24 + $0x18] sm:$0xff] }
  0x28   : > { %551 = vperm.xlu0 %980, %v509_v43  }
  0x29   : > { %866 = vmatmul.msk.f32.gmra.mxu0 %vm340_vm0, %v324_v6  ;;  %876 = vmatmul.msk.f32.gmra.mxu3 %vm340_vm0, %v334_v7  ;;  %v511_v6 = vld [vmem:[%s1431_s4 + $0x40] sm:$0xff]  ;;  %v473_v7 = vld [vmem:[%s1430_s3 + $0x10] sm:$0xff] }
  0x2a   : > { %556 = vperm.xlu1 %981, %v510_v50   ;;  %v672_v50 = vld [vmem:[%s1327_s24 + $0x40] sm:$0xff] }
  0x2e   : > { %561 = vperm.xlu2 %982, %v511_v6  }
  0x30   : > { %566 = vperm.xlu0 %980, %v512_v46  }
  0x31   : > { %867 = vmatmul.msk.f32.gmra.mxu0 %vm340_vm0, %v325_v8  ;;  %877 = vmatmul.msk.f32.gmra.mxu3 %vm340_vm0, %v335_v9  ;;  %v480_v8 = vld [vmem:[%s1430_s3 + $0x48] sm:$0xff]  ;;  %v514_v9 = vld [vmem:[%s1431_s4 + $0x58] sm:$0xff] }
  0x32   : > { %571 = vperm.xlu1 %981, %v513_v57  }
  0x36   : > { %576 = vperm.xlu2 %982, %v514_v9  }
  0x38   : > { %581 = vperm.xlu0 %980, %v515_v51  }
  0x39   : > { %868 = vmatmul.msk.f32.gmra.mxu0 %vm340_vm0, %v326_v10  ;;  %878 = vmatmul.msk.f32.gmra.mxu3 %vm340_vm0, %v336_v11  ;;  %v474_v10 = vld [vmem:[%s1430_s3 + $0x18] sm:$0xff]  ;;  %v481_v11 = vld [vmem:[%s1430_s3 + $0x50] sm:$0xff] }
  0x3a   : > { %586 = vperm.xlu1 %981, %v516_v2  }
  0x40   : > { %596 = vperm.xlu0 %980, %v518_v59  }
  0x41   : > { %869 = vmatmul.msk.f32.gmra.mxu0 %vm340_vm0, %v327_v12  ;;  %879 = vmatmul.msk.f32.gmra.mxu3 %vm340_vm0, %v337_v13  ;;  %v517_v12 = vld [vmem:[%s1431_s4 + $0x70] sm:$0xff]  ;;  %v475_v13 = vld [vmem:[%s1430_s3 + $0x20] sm:$0xff] }
  0x42   : > { %591 = vperm.xlu2 %982, %v517_v12  }
  0x49   : > { %870 = vmatmul.msk.f32.gmra.mxu0 %vm340_vm0, %v328_v14  ;;  %v482_v14 = vld [vmem:[%s1430_s3 + $0x58] sm:$0xff] }
  0x51   : > { %871 = vmatmul.msk.f32.gmra.mxu0 %vm340_vm0, %v329_v15  ;;  %v476_v15 = vld [vmem:[%s1430_s3 + $0x28] sm:$0xff] }
  0x59   : > { %872 = vmatmul.msk.f32.gmra.mxu0 %vm340_vm0, %v330_v16  ;;  %v483_v16 = vld [vmem:[%s1430_s3 + $0x60] sm:$0xff] }
  0x61   : > { %873 = vmatmul.msk.f32.gmra.mxu0 %vm340_vm0, %v331_v17  ;;  %v477_v17 = vld [vmem:[%s1430_s3 + $0x30] sm:$0xff] }
  0x96   : > { %v406_v18 = vpop.f32.mrf.mxu0 }
  0x97   : > { %455 = vst.msk [vmem:[#allocation2] sm:$0xff] %vm454_vm1, %v406_v18  ;;  %v484_v18 = vld [vmem:[%s1430_s3 + $0x68] sm:$0xff] }
  0x9c   : > { %v436_v19 = vpop.f32.mrf.mxu3 }
  0x9d   : > { %465 = vst.msk [vmem:[#allocation2 + $0x50] sm:$0xff] %vm454_vm1, %v436_v19  ;;  %v522_v19 = vpop.permute.xlu0 %521 }
  0x9e   : > { %v409_v20 = vpop.f32.mrf.mxu0  ;;  %v487_v62 = vld [vmem:[#allocation2] sm:$0xff] }
  0x9f   : > { %456 = vst.msk [vmem:[#allocation2 + $0x8] sm:$0xff] %vm454_vm1, %v409_v20  ;;  %v1313_v20 = vpop.permute.xlu2 %541 }
  0xa4   : > { %v439_v21 = vpop.f32.mrf.mxu3  ;;  %v497_v41 = vld [vmem:[#allocation2 + $0x50] sm:$0xff] }
  0xa5   : > { %466 = vst.msk [vmem:[#allocation2 + $0x58] sm:$0xff] %vm454_vm1, %v439_v21  ;;  %v527_v21 = vpop.permute.xlu0 %526 }
  0xa6   : > { %v412_v22 = vpop.f32.mrf.mxu0  ;;  %v488_v60 = vld [vmem:[#allocation2 + $0x8] sm:$0xff] }
  0xa7   : > { %457 = vst.msk [vmem:[#allocation2 + $0x10] sm:$0xff] %vm454_vm1, %v412_v22  ;;  %v1315_v22 = vpop.permute.xlu2 %546 }
  0xac   : > { %v442_v23 = vpop.f32.mrf.mxu3  ;;  %v498_v39 = vld [vmem:[#allocation2 + $0x58] sm:$0xff] }
  0xad   : > { %467 = vst.msk [vmem:[#allocation2 + $0x60] sm:$0xff] %vm454_vm1, %v442_v23  ;;  %v1317_v23 = vpop.permute.xlu0 %551 }
  0xae   : > { %v415_v24 = vpop.f32.mrf.mxu0  ;;  %v489_v58 = vld [vmem:[#allocation2 + $0x10] sm:$0xff] }
  0xaf   : > { %458 = vst.msk [vmem:[#allocation2 + $0x18] sm:$0xff] %vm454_vm1, %v415_v24  ;;  %v532_v24 = vpop.permute.xlu1 %531 }
  0xb4   : > { %v445_v25 = vpop.f32.mrf.mxu3  ;;  %v499_v37 = vld [vmem:[#allocation2 + $0x60] sm:$0xff] }
  0xb5   : > { %468 = vst.msk [vmem:[#allocation2 + $0x68] sm:$0xff] %vm454_vm1, %v445_v25  ;;  %v562_v25 = vpop.permute.xlu2 %561 }
  0xb6   : > { %v418_v26 = vpop.f32.mrf.mxu0  ;;  %v490_v55 = vld [vmem:[#allocation2 + $0x18] sm:$0xff] }
  0xb7   : > { %459 = vst.msk [vmem:[#allocation2 + $0x20] sm:$0xff] %vm454_vm1, %v418_v26  ;;  %v567_v26 = vpop.permute.xlu0 %566 }
  0xbc   : > { %v448_v27 = vpop.f32.mrf.mxu3  ;;  %v500_v36 = vld [vmem:[#allocation2 + $0x68] sm:$0xff] }
  0xbd   : > { %469 = vst.msk [vmem:[#allocation2 + $0x70] sm:$0xff] %vm454_vm1, %v448_v27  ;;  %v537_v27 = vpop.permute.xlu1 %536 }
  0xbe   : > { %v421_v28 = vpop.f32.mrf.mxu0  ;;  %v491_v54 = vld [vmem:[#allocation2 + $0x20] sm:$0xff] }
  0xbf   : > { %460 = vst.msk [vmem:[#allocation2 + $0x28] sm:$0xff] %vm454_vm1, %v421_v28  ;;  %v1319_v28 = vpop.permute.xlu2 %576 }
  0xc4   : > { %v451_v29 = vpop.f32.mrf.mxu3  ;;  %v501_v34 = vld [vmem:[#allocation2 + $0x70] sm:$0xff] }
  0xc5   : > { %470 = vst.msk [vmem:[#allocation2 + $0x78] sm:$0xff] %vm454_vm1, %v451_v29 }
  0xc6   : > { %v424_v30 = vpop.f32.mrf.mxu0  ;;  %v492_v53 = vld [vmem:[#allocation2 + $0x28] sm:$0xff] }
  0xc7   : > { %461 = vst.msk [vmem:[#allocation2 + $0x30] sm:$0xff] %vm454_vm1, %v424_v30  ;;  %v664_v30 = vld [vmem:[%s1327_s24] sm:$0xff] }
  0xcc   : > { %v502_v33 = vld [vmem:[#allocation2 + $0x78] sm:$0xff] }
  0xcd   : > { %599 = vmatpush.msra.mxu1 %v502_v33  ;;  %890 = vmatpush.msra.mxu2 %v502_v33 }
  0xce   : > { %891 = vmatpush.msrb.mxu3 %v502_v33  ;;  %v427_v35 = vpop.f32.mrf.mxu0  ;;  %v493_v52 = vld [vmem:[#allocation2 + $0x30] sm:$0xff]  ;;  %v1332_v33 = vpop.permute.xlu0 %581 }
  0xcf   : > { %462 = vst.msk [vmem:[#allocation2 + $0x38] sm:$0xff] %vm454_vm1, %v427_v35  ;;  %600 = vmatpush.msra.mxu1 %v501_v34  ;;  %892 = vmatpush.msra.mxu2 %v501_v34  ;;  %v592_v35 = vpop.permute.xlu2 %591 }
  0xd0   : > { %893 = vmatpush.msrb.mxu3 %v501_v34  ;;  %v557_v34 = vpop.permute.xlu1 %556 }
  0xd1   : > { %601 = vmatpush.msra.mxu1 %v500_v36  ;;  %894 = vmatpush.msra.mxu2 %v500_v36 }
  0xd2   : > { %895 = vmatpush.msrb.mxu3 %v500_v36 }
  0xd3   : > { %602 = vmatpush.msra.mxu1 %v499_v37  ;;  %896 = vmatpush.msra.mxu2 %v499_v37 }
  0xd4   : > { %897 = vmatpush.msrb.mxu3 %v499_v37  ;;  %v671_v37 = vld [vmem:[%s1327_s24 + $0x38] sm:$0xff] }
  0xd5   : > { %603 = vmatpush.msra.mxu1 %v498_v39  ;;  %898 = vmatpush.msra.mxu2 %v498_v39 }
  0xd6   : > { %899 = vmatpush.msrb.mxu3 %v498_v39  ;;  %v430_v40 = vpop.f32.mrf.mxu0  ;;  %v494_v49 = vld [vmem:[#allocation2 + $0x38] sm:$0xff]  ;;  %v678_v39 = vld [vmem:[%s1327_s24 + $0x70] sm:$0xff] }
  0xd7   : > { %463 = vst.msk [vmem:[#allocation2 + $0x40] sm:$0xff] %vm454_vm1, %v430_v40  ;;  %604 = vmatpush.msra.mxu1 %v497_v41  ;;  %900 = vmatpush.msra.mxu2 %v497_v41 }
  0xd8   : > { %901 = vmatpush.msrb.mxu3 %v497_v41 }
  0xde   : > { %v433_v44 = vpop.f32.mrf.mxu0  ;;  %v495_v48 = vld [vmem:[#allocation2 + $0x40] sm:$0xff] }
  0xdf   : > { %464 = vst.msk [vmem:[#allocation2 + $0x48] sm:$0xff] %vm454_vm1, %v433_v44 }
  0xe6   : > { %v496_v47 = vld [vmem:[#allocation2 + $0x48] sm:$0xff] }
  0xe7   : > { %605 = vmatpush.msra.mxu1 %v496_v47  ;;  %902 = vmatpush.msra.mxu2 %v496_v47 }
  0xe8   : > { %903 = vmatpush.msrb.mxu3 %v496_v47 }
  0xe9   : > { %606 = vmatpush.msra.mxu1 %v495_v48  ;;  %904 = vmatpush.msra.mxu2 %v495_v48 }
  0xea   : > { %905 = vmatpush.msrb.mxu3 %v495_v48  ;;  %v597_v48 = vpop.permute.xlu0 %596 }
  0xeb   : > { %607 = vmatpush.msra.mxu1 %v494_v49  ;;  %906 = vmatpush.msra.mxu2 %v494_v49 }
  0xec   : > { %907 = vmatpush.msrb.mxu3 %v494_v49 }
  0xed   : > { %608 = vmatpush.msra.mxu1 %v493_v52  ;;  %908 = vmatpush.msra.mxu2 %v493_v52 }
  0xee   : > { %909 = vmatpush.msrb.mxu3 %v493_v52  ;;  %v679_v52 = vld [vmem:[%s1327_s24 + $0x78] sm:$0xff] }
  0xef   : > { %609 = vmatpush.msra.mxu1 %v492_v53  ;;  %910 = vmatpush.msra.mxu2 %v492_v53 }
  0xf0   : > { %911 = vmatpush.msrb.mxu3 %v492_v53 }
  0xf1   : > { %610 = vmatpush.msra.mxu1 %v491_v54  ;;  %912 = vmatpush.msra.mxu2 %v491_v54 }
  0xf2   : > { %913 = vmatpush.msrb.mxu3 %v491_v54 }
  0xf3   : > { %611 = vmatpush.msra.mxu1 %v490_v55  ;;  %914 = vmatpush.msra.mxu2 %v490_v55 }
  0xf4   : > { %915 = vmatpush.msrb.mxu3 %v490_v55 }
  0xf5   : > { %612 = vmatpush.msra.mxu1 %v489_v58  ;;  %916 = vmatpush.msra.mxu2 %v489_v58 }
  0xf6   : > { %917 = vmatpush.msrb.mxu3 %v489_v58 }
  0xf7   : > { %613 = vmatpush.msra.mxu1 %v488_v60  ;;  %918 = vmatpush.msra.mxu2 %v488_v60 }
  0xf8   : > { %919 = vmatpush.msrb.mxu3 %v488_v60 }
  0xf9   : > { %614 = vmatpush.msra.mxu1 %v487_v62  ;;  %920 = vmatpush.msra.mxu2 %v487_v62 }
  0xfa   : > { %921 = vmatpush.msrb.mxu3 %v487_v62  ;;  %615 = vmatmul.f32.vlgmr.msra.gmra.mxu1 %v471_v61  ;;  %v673_v62 = vld [vmem:[%s1327_s24 + $0x48] sm:$0xff] }
  0xfb   : > { %636 = vmatmul.f32.vlgmr.msra.gmra.mxu2 %v478_v63  ;;  %657 = vmatmul.f32.vlgmr.msrb.gmra.mxu3 %v485_v0 }
 0x102   : > { %618 = vmatmul.f32.gmra.mxu1 %v472_v3 }
 0x103   : > { %639 = vmatmul.f32.gmra.mxu2 %v479_v4  ;;  %660 = vmatmul.f32.gmra.mxu3 %v486_v5  ;;  %v572_v5 = vpop.permute.xlu1 %571 }
 0x10a   : > { %621 = vmatmul.f32.gmra.mxu1 %v473_v7  ;;  %v674_v7 = vld [vmem:[%s1327_s24 + $0x50] sm:$0xff] }
 0x10b   : > { %642 = vmatmul.f32.gmra.mxu2 %v480_v8 }
 0x112   : > { %624 = vmatmul.f32.gmra.mxu1 %v474_v10  ;;  %v668_v10 = vld [vmem:[%s1327_s24 + $0x20] sm:$0xff] }
 0x113   : > { %645 = vmatmul.f32.gmra.mxu2 %v481_v11 }
 0x11a   : > { %627 = vmatmul.f32.gmra.mxu1 %v475_v13 }
 0x11b   : > { %648 = vmatmul.f32.gmra.mxu2 %v482_v14 }
 0x122   : > { %630 = vmatmul.f32.gmra.mxu1 %v476_v15  ;;  %v675_v15 = vld [vmem:[%s1327_s24 + $0x58] sm:$0xff] }
 0x123   : > { %651 = vmatmul.f32.gmra.mxu2 %v483_v16 }
 0x12a   : > { %633 = vmatmul.f32.gmra.mxu1 %v477_v17 }
 0x12b   : > { %654 = vmatmul.f32.gmra.mxu2 %v484_v18  ;;  %v669_v18 = vld [vmem:[%s1327_s24 + $0x28] sm:$0xff] }
 0x177   : > { %v616_v29 = vpop.f32.mrf.mxu1 }
 0x178   : > { %v617_v31 = vadd.f32 %v616_v29, %v522_v19 }
 0x17a   : > { %v680_v32 = vadd.f32 %v664_v30, %v617_v31  ;;  %v587_v31 = vpop.permute.xlu1 %586 }
 0x17c   : > { %697 = vst.msk [vmem:[%s1334_s27] sm:$0xff] %vm454_vm1, %v680_v32 }
 0x17e   : > { %v637_v36 = vpop.f32.mrf.mxu2  ;;  %v658_v38 = vpop.f32.mrf.mxu3 }
 0x17f   : > { %v638_v40 = vadd.f32 %v637_v36, %v557_v34  ;;  %v619_v41 = vpop.f32.mrf.mxu1  ;;  %v659_v43 = vadd.f32 %v658_v38, %v592_v35 }
 0x180   : > { %v620_v44 = vadd.f32 %v619_v41, %v527_v21 }
 0x181   : > { %v687_v45 = vadd.f32 %v671_v37, %v638_v40  ;;  %v694_v46 = vadd.f32 %v678_v39, %v659_v43 }
 0x182   : > { %v681_v47 = vadd.f32 %v665_v42, %v620_v44 }
 0x183   : > { %704 = vst.msk [vmem:[%s1334_s27 + $0x38] sm:$0xff] %vm454_vm1, %v687_v45 }
 0x184   : > { %698 = vst.msk [vmem:[%s1334_s27 + $0x8] sm:$0xff] %vm454_vm1, %v681_v47 }
 0x185   : > { %711 = vst.msk [vmem:[%s1334_s27 + $0x70] sm:$0xff] %vm454_vm1, %v694_v46 }
 0x186   : > { %v640_v49 = vpop.f32.mrf.mxu2  ;;  %v661_v51 = vpop.f32.mrf.mxu3 }
 0x187   : > { %v641_v53 = vadd.f32 %v640_v49, %v562_v25  ;;  %v662_v54 = vadd.f32 %v661_v51, %v597_v48  ;;  %v622_v55 = vpop.f32.mrf.mxu1  ;;  %v676_v25 = vld [vmem:[%s1327_s24 + $0x60] sm:$0xff] }
 0x188   : > { %v623_v57 = vadd.f32 %v622_v55, %v532_v24 }
 0x189   : > { %v688_v58 = vadd.f32 %v672_v50, %v641_v53  ;;  %v695_v59 = vadd.f32 %v679_v52, %v662_v54 }
 0x18a   : > { %v682_v60 = vadd.f32 %v666_v56, %v623_v57 }
 0x18b   : > { %705 = vst.msk [vmem:[%s1334_s27 + $0x40] sm:$0xff] %vm454_vm1, %v688_v58 }
 0x18c   : > { %712 = vst.msk [vmem:[%s1334_s27 + $0x78] sm:$0xff] %vm454_vm1, %v695_v59 }
 0x18d   : > { %699 = vst.msk [vmem:[%s1334_s27 + $0x10] sm:$0xff] %vm454_vm1, %v682_v60 }
 0x18e   : > { %v643_v61 = vpop.f32.mrf.mxu2 }
 0x18f   : > { %v644_v63 = vadd.f32 %v643_v61, %v567_v26  ;;  %v625_v0 = vpop.f32.mrf.mxu1 }
 0x190   : > { %v626_v2 = vadd.f32 %v625_v0, %v537_v27 }
 0x191   : > { %v689_v3 = vadd.f32 %v673_v62, %v644_v63 }
 0x192   : > { %v683_v4 = vadd.f32 %v667_v1, %v626_v2 }
 0x193   : > { %706 = vst.msk [vmem:[%s1334_s27 + $0x48] sm:$0xff] %vm454_vm1, %v689_v3 }
 0x194   : > { %700 = vst.msk [vmem:[%s1334_s27 + $0x18] sm:$0xff] %vm454_vm1, %v683_v4 }
 0x196   : > { %v646_v6 = vpop.f32.mrf.mxu2 }
 0x197   : > { %v647_v8 = vadd.f32 %v646_v6, %v572_v5  ;;  %v628_v9 = vpop.f32.mrf.mxu1 }
 0x198   : > { %v629_v11 = vadd.f32 %v628_v9, %v1313_v20 }
 0x199   : > { %v690_v12 = vadd.f32 %v674_v7, %v647_v8 }
 0x19a   : > { %v684_v13 = vadd.f32 %v668_v10, %v629_v11 }
 0x19b   : > { %707 = vst.msk [vmem:[%s1334_s27 + $0x50] sm:$0xff] %vm454_vm1, %v690_v12 }
 0x19c   : > { %701 = vst.msk [vmem:[%s1334_s27 + $0x20] sm:$0xff] %vm454_vm1, %v684_v13 }
 0x19e   : > { %v649_v14 = vpop.f32.mrf.mxu2 }
 0x19f   : > { %v650_v16 = vadd.f32 %v649_v14, %v1319_v28  ;;  %v631_v17 = vpop.f32.mrf.mxu1  ;;  %v670_v28 = vld [vmem:[%s1327_s24 + $0x30] sm:$0xff] }
 0x1a0   : > { %v632_v19 = vadd.f32 %v631_v17, %v1315_v22 }
 0x1a1   : > { %v691_v20 = vadd.f32 %v675_v15, %v650_v16 }
 0x1a2   : > { %v685_v21 = vadd.f32 %v669_v18, %v632_v19 }
 0x1a3   : > { %708 = vst.msk [vmem:[%s1334_s27 + $0x58] sm:$0xff] %vm454_vm1, %v691_v20 }
 0x1a4   : > { %702 = vst.msk [vmem:[%s1334_s27 + $0x28] sm:$0xff] %vm454_vm1, %v685_v21 }
 0x1a6   : > { %v652_v24 = vpop.f32.mrf.mxu2 }
 0x1a7   : > { %v653_v26 = vadd.f32 %v652_v24, %v1332_v33  ;;  %v634_v27 = vpop.f32.mrf.mxu1  ;;  %v677_v33 = vld [vmem:[%s1327_s24 + $0x68] sm:$0xff] }
 0x1a8   : > { %v635_v29 = vadd.f32 %v634_v27, %v1317_v23 }
 0x1a9   : > { %v692_v22 = vadd.f32 %v676_v25, %v653_v26 }
 0x1aa   : > { %v686_v30 = vadd.f32 %v670_v28, %v635_v29 }
 0x1ab   : > { %709 = vst.msk [vmem:[%s1334_s27 + $0x60] sm:$0xff] %vm454_vm1, %v692_v22 }
 0x1ac   : > { %703 = vst.msk [vmem:[%s1334_s27 + $0x30] sm:$0xff] %vm454_vm1, %v686_v30 }
 0x1ae   : > { %v655_v32 = vpop.f32.mrf.mxu2 }
 0x1af   : > { %v656_v34 = vadd.f32 %v655_v32, %v587_v31 }
 0x1b1   : > { %v693_v23 = vadd.f32 %v677_v33, %v656_v34 }
 0x1b3   : > { %710 = vst.msk [vmem:[%s1334_s27 + $0x68] sm:$0xff] %vm454_vm1, %v693_v23 }
 0x1b4   : > { %1010 = shalt.err (!%p1007_p5)
}
 0x1b5   : > { %s1064_s15 = smov 128   ;;  %s1065_s27 = smov 8  }
 0x1b6   : > { %922 = dma.vmem_to_hbm [thread:$0]  (%p1136_p4), %s729_s8, 2048, %s731_s9, %s714_s21, %s1064_s15, %s1064_s15, %s1065_s27  }
 0x1b7 PF: > { %p928_p6 = scmp.ge.s32.totalorder %s1061_s23, 2  ;;  %s745_s11 = sand.u32 1, %s1041_s18  }
 0x1b8   : > { %s746_s12 = scalar_lea.sflag [#allocation4], %s745_s11 }
 0x1b9   : > { %p925_p7 = pnand %p928_p6, %p1143_p8 }
 0x1bb   : > { %p926_p9 = pneg %p925_p7 }
 0x1bd   : > { %1036 = dma.done.wait (%p926_p9), %s746_s12, 2048  }
 0x1be   : > { %1038 = vsyncadd (%p926_p9), %s746_s12, 4294965248  ;;  %s18_s23 = sadd.s32 1, %s1061_s23   ;;  %s1435_s18 = smov %s1045_s19 }
 0x1bf   : > { %p15_p10 = scmp.ge.s32.totalorder %s18_s23, 4   ;;  %s1436_s19 = smov %s1049_s20 }
 0x1c0   : > { %s1437_s20 = smov %s1149_s6  ;;  %s1438_s21 = smov %s1057_s22 }
 0x1c1   : > { %s1439_s22 = smov %s1441_s26  ;;  %17 = sbr.rel (!%p15_p10) target bundleno = 4 (0x4), region = 88 }
 0x1c6   :  { %752 = vsyncpa [#allocation4], 1 }
 0x1c7   :  { %754 = vsyncpa [#allocation4 + $0x1], 1 }

</bundles_post_ra>
